<compile_context>
chip_gen: v7x
topology: tpu7x:2x2x1
jax: 0.10.0
libtpu: 0.0.40
codegen_flags: <defaults>
</compile_context>

<pallas_src>
import functools
import math

import jax
import jax.numpy as jnp
from jax.experimental import pallas as pl
from jax.experimental.pallas import tpu as pltpu


def _round_up(x, n):
    return ((x + n - 1) // n) * n


# ------------------------------------------------------------------ linear ----
def _linear_kernel(x_ref, w_ref, b_ref, o_ref):
    # x_ref: (bm, d_in)  w_ref: (d_in, d_out)  b_ref: (1, d_out)  o_ref: (bm, d_out)
    acc = jnp.dot(x_ref[...], w_ref[...], preferred_element_type=jnp.float32)
    o_ref[...] = (acc + b_ref[...].astype(jnp.float32)).astype(o_ref.dtype)


def _linear(x2d, w_t, b2d, *, block_m):
    """Fused y = x @ W^T + b.  x2d: (m, d_in); w_t: (d_in, d_out) pre-transposed."""
    m, d_in = x2d.shape
    d_out = w_t.shape[1]
    bm = min(block_m, _round_up(m, 8))          # large row tile, f32-sublane aligned
    m_pad = _round_up(m, bm)                    # cdiv-style grid via padding (no assert)
    if m_pad != m:
        x2d = jnp.pad(x2d, ((0, m_pad - m), (0, 0)))

    out = pl.pallas_call(
        _linear_kernel,
        out_shape=jax.ShapeDtypeStruct((m_pad, d_out), x2d.dtype),
        grid_spec=pl.GridSpec(
            grid=(m_pad // bm,),
            in_specs=[
                pl.BlockSpec((bm, d_in), lambda i: (i, 0)),      # x row tile
                pl.BlockSpec((d_in, d_out), lambda i: (0, 0)),   # W^T, resident across grid
                pl.BlockSpec((1, d_out), lambda i: (0, 0)),      # bias, resident across grid
            ],
            out_specs=pl.BlockSpec((bm, d_out), lambda i: (i, 0)),
        ),
        compiler_params=pltpu.CompilerParams(
            dimension_semantics=("parallel",),
        ),
    )(x2d, w_t, b2d)
    return out[:m] if m_pad != m else out


# --------------------------------------------------------------- attention ----
def _sdpa_kernel(q_ref, k_ref, v_ref, o_ref, *, scale):
    # q_ref: (tq, dh)  k_ref/v_ref: (s, dh)  o_ref: (tq, dh)
    q = q_ref[...].astype(jnp.float32)
    k = k_ref[...].astype(jnp.float32)
    scores = jnp.einsum("td,sd->ts", q, k,
                        preferred_element_type=jnp.float32) * scale     # (tq, s)
    m = jnp.max(scores, axis=-1, keepdims=True)
    p = jnp.exp(scores - m)
    l = jnp.sum(p, axis=-1, keepdims=True)
    o = jnp.dot(p.astype(v_ref.dtype), v_ref[...],
                preferred_element_type=jnp.float32)                     # (tq, dh)
    o_ref[...] = (o / l).astype(o_ref.dtype)


def _sdpa(q_h, k_h, v_h, *, block_q):
    """q_h: (B*H, T, dh); k_h/v_h: (B*H, S, dh). Full-S KV block resident per head."""
    bh, t, dh = q_h.shape
    s_len = k_h.shape[1]
    tq = min(block_q, _round_up(t, 8))
    t_pad = _round_up(t, tq)
    if t_pad != t:
        q_h = jnp.pad(q_h, ((0, 0), (0, t_pad - t), (0, 0)))  # padded q rows sliced off below
    scale = 1.0 / math.sqrt(dh)

    out = pl.pallas_call(
        functools.partial(_sdpa_kernel, scale=scale),
        out_shape=jax.ShapeDtypeStruct((bh, t_pad, dh), q_h.dtype),
        grid_spec=pl.GridSpec(
            grid=(bh, t_pad // tq),
            in_specs=[
                pl.BlockSpec((None, tq, dh), lambda b, i: (b, i, 0)),     # q tile
                pl.BlockSpec((None, s_len, dh), lambda b, i: (b, 0, 0)),  # full K for head b
                pl.BlockSpec((None, s_len, dh), lambda b, i: (b, 0, 0)),  # full V for head b
            ],
            out_specs=pl.BlockSpec((None, tq, dh), lambda b, i: (b, i, 0)),
        ),
        compiler_params=pltpu.CompilerParams(
            dimension_semantics=("parallel", "parallel"),
        ),
    )(q_h, k_h, v_h)
    return out[:, :t] if t_pad != t else out


# ------------------------------------------------------------------- module ----
@functools.partial(jax.jit, static_argnames=("n_heads", "block_m", "block_q"))
def multi_head_attention(in_q, in_k, in_v, params, *, n_heads, block_m=256, block_q=256):
    """params = (wq_t, bq, wk_t, bk, wv_t, bv, wo_t, bo), weights pre-transposed
    to (d_in, d_model) / (d_model, d_model) outside this jitted call."""
    # TODO(synk): optional attn_mask argument not implemented (module default mask=None path only).
    wq_t, bq, wk_t, bk, wv_t, bv, wo_t, bo = params
    b, t, d_q = in_q.shape
    _, s_len, d_k = in_k.shape
    d_v = in_v.shape[-1]
    d_model = wq_t.shape[1]
    assert d_model % n_heads == 0
    dh = d_model // n_heads

    # Q/K/V projections: rows = batch*seq, model dim on the lane axis.
    q2d = _linear(in_q.reshape(b * t, d_q), wq_t, bq.reshape(1, d_model), block_m=block_m)
    k2d = _linear(in_k.reshape(b * s_len, d_k), wk_t, bk.reshape(1, d_model), block_m=block_m)
    v2d = _linear(in_v.reshape(b * s_len, d_v), wv_t, bv.reshape(1, d_model), block_m=block_m)

    # Head split (XLA glue / layout plumbing): (B, L, H, dh) -> (B*H, L, dh)
    q_h = q2d.reshape(b, t, n_heads, dh).transpose(0, 2, 1, 3).reshape(b * n_heads, t, dh)
    k_h = k2d.reshape(b, s_len, n_heads, dh).transpose(0, 2, 1, 3).reshape(b * n_heads, s_len, dh)
    v_h = v2d.reshape(b, s_len, n_heads, dh).transpose(0, 2, 1, 3).reshape(b * n_heads, s_len, dh)

    z = _sdpa(q_h, k_h, v_h, block_q=block_q)                     # (B*H, T, dh)
    z = z.reshape(b, n_heads, t, dh).transpose(0, 2, 1, 3).reshape(b * t, d_model)

    out = _linear(z, wo_t, bo.reshape(1, d_model), block_m=block_m)
    return out.reshape(b, t, d_model)


# ------------------------------------------------------------- params / ref ----
def _init_params(key, d_q, d_k, d_v, d_model, dtype=jnp.float32):
    """Deterministic init mimicking nn.Linear defaults (uniform +-1/sqrt(fan_in))."""
    ks = jax.random.split(key, 8)

    def linear_init(kw, kb, fan_in, fan_out):
        lim = 1.0 / math.sqrt(fan_in)
        w = jax.random.uniform(kw, (fan_out, fan_in), dtype, -lim, lim)
        bias = jax.random.uniform(kb, (fan_out,), dtype, -lim, lim)
        return w, bias

    wq, bq = linear_init(ks[0], ks[1], d_q, d_model)
    wk, bk = linear_init(ks[2], ks[3], d_k, d_model)
    wv, bv = linear_init(ks[4], ks[5], d_v, d_model)
    wo, bo = linear_init(ks[6], ks[7], d_model, d_model)
    return (wq, bq, wk, bk, wv, bv, wo, bo)


def prepare_params(raw):
    """Pre-transpose weights ONCE, outside the jitted forward (perf review item)."""
    wq, bq, wk, bk, wv, bv, wo, bo = raw
    return (wq.T, bq, wk.T, bk, wv.T, bv, wo.T, bo)


def _reference_mha(in_q, in_k, in_v, raw_params, n_heads):
    wq, bq, wk, bk, wv, bv, wo, bo = raw_params
    b, t, _ = in_q.shape
    s_len = in_k.shape[1]
    d_model = wq.shape[0]
    dh = d_model // n_heads
    q = (in_q @ wq.T + bq).reshape(b, t, n_heads, dh).transpose(0, 2, 1, 3)
    k = (in_k @ wk.T + bk).reshape(b, s_len, n_heads, dh).transpose(0, 2, 1, 3)
    v = (in_v @ wv.T + bv).reshape(b, s_len, n_heads, dh).transpose(0, 2, 1, 3)
    scores = jnp.einsum("bhtd,bhsd->bhts", q, k) / math.sqrt(dh)
    attn = jax.nn.softmax(scores, axis=-1)
    z = jnp.einsum("bhts,bhsd->bhtd", attn, v)
    z = z.transpose(0, 2, 1, 3).reshape(b, t, d_model)
    return z @ wo.T + bo


if __name__ == "__main__":
    d_q = d_k = d_v = 32
    d_model, n_heads = 32, 4
    batch, t_len, s_len = 2, 10, 12   # non-multiples exercise the cdiv/padding paths

    key = jax.random.PRNGKey(0)
    kq, kk, kv, kp = jax.random.split(key, 4)
    in_q = jax.random.normal(kq, (batch, t_len, d_q), jnp.float32)
    in_k = jax.random.normal(kk, (batch, s_len, d_k), jnp.float32)
    in_v = jax.random.normal(kv, (batch, s_len, d_v), jnp.float32)

    raw_params = _init_params(kp, d_q, d_k, d_v, d_model)
    params = prepare_params(raw_params)   # transpose once, outside jit

    out = multi_head_attention(in_q, in_k, in_v, params, n_heads=n_heads)
    out = jax.block_until_ready(out)

    ref = _reference_mha(in_q, in_k, in_v, raw_params, n_heads)
    assert out.shape == (batch, t_len, d_model)
    max_err = float(jnp.max(jnp.abs(out - ref)))
    assert jnp.allclose(out, ref, atol=5e-4, rtol=5e-4), f"max abs err = {max_err}"

    print("KERNEL_OK")
</pallas_src>

<mosaic_0001>
module attributes {stable_mosaic.version = 11 : i64} {
  func.func @_linear_kernel(%arg0: i32, %arg1: memref<24x32xf32, #tpu.memory_space<vmem>>, %arg2: memref<32x32xf32, #tpu.memory_space<vmem>>, %arg3: memref<1x32xf32, #tpu.memory_space<vmem>>, %arg4: memref<24x32xf32, #tpu.memory_space<vmem>>) attributes {dimension_semantics = [#tpu.dimension_semantics<parallel>], iteration_bounds = array<i64: 1>, scalar_prefetch = 0 : i64, scratch_operands = 0 : i64, tpu.core_type = #tpu.core_type<tc>, window_params = [{transform_indices = @transform_0, window_bounds = array<i64: 24, 32>}, {pipeline_mode = #tpu.pipeline_mode<synchronous>, transform_indices = @transform_1, window_bounds = array<i64: 32, 32>}, {pipeline_mode = #tpu.pipeline_mode<synchronous>, transform_indices = @transform_2, window_bounds = array<i64: 1, 32>}, {transform_indices = @transform_3, window_bounds = array<i64: 24, 32>}]} {
    %c0 = arith.constant 0 : index
    %c0_0 = arith.constant 0 : index
    %0 = vector.load %arg1[%c0, %c0_0] : memref<24x32xf32, #tpu.memory_space<vmem>>, vector<24x32xf32>
    %c0_1 = arith.constant 0 : index
    %c0_2 = arith.constant 0 : index
    %1 = vector.load %arg2[%c0_1, %c0_2] : memref<32x32xf32, #tpu.memory_space<vmem>>, vector<32x32xf32>
    %cst = arith.constant dense<0.000000e+00> : vector<24x32xf32>
    %2 = tpu.matmul %0, %1, %cst {dimension_numbers = #tpu.dot_dimension_numbers<[1], [0], [0], [1], [0, 0, 1, 1], [], []>} : vector<24x32xf32>, vector<32x32xf32>, vector<24x32xf32> -> vector<24x32xf32>
    %c0_3 = arith.constant 0 : index
    %c0_4 = arith.constant 0 : index
    %3 = vector.load %arg3[%c0_3, %c0_4] : memref<1x32xf32, #tpu.memory_space<vmem>>, vector<1x32xf32>
    %4 = vector.broadcast %3 : vector<1x32xf32> to vector<24x32xf32>
    %5 = arith.addf %2, %4 : vector<24x32xf32>
    %c0_5 = arith.constant 0 : index
    %c0_6 = arith.constant 0 : index
    %6 = vector.load %arg4[%c0_5, %c0_6] : memref<24x32xf32, #tpu.memory_space<vmem>>, vector<24x32xf32>
    tpu.vector_store %arg4[%c0_5, %c0_6], %5 {strides = array<i32>} : memref<24x32xf32, #tpu.memory_space<vmem>>, vector<24x32xf32>,
    return
  }
  func.func @transform_0(%arg0: i32) -> (i32, i32) {
    %c0_i32 = arith.constant 0 : i32
    %c0_i32_0 = arith.constant 0 : i32
    return %arg0, %c0_i32 : i32, i32
  }
  func.func @transform_1(%arg0: i32) -> (i32, i32) {
    %c0_i32 = arith.constant 0 : i32
    %c0_i32_0 = arith.constant 0 : i32
    %c0_i32_1 = arith.constant 0 : i32
    return %c0_i32, %c0_i32_0 : i32, i32
  }
  func.func @transform_2(%arg0: i32) -> (i32, i32) {
    %c0_i32 = arith.constant 0 : i32
    %c0_i32_0 = arith.constant 0 : i32
    %c0_i32_1 = arith.constant 0 : i32
    return %c0_i32, %c0_i32_0 : i32, i32
  }
  func.func @transform_3(%arg0: i32) -> (i32, i32) {
    %c0_i32 = arith.constant 0 : i32
    %c0_i32_0 = arith.constant 0 : i32
    return %arg0, %c0_i32 : i32, i32
  }
}

module attributes {stable_mosaic.version = 11 : i64} {
  func.func @_sdpa_kernel(%arg0: i32, %arg1: i32, %arg2: memref<1x16x8xf32, #tpu.memory_space<vmem>>, %arg3: memref<1x12x8xf32, #tpu.memory_space<vmem>>, %arg4: memref<1x12x8xf32, #tpu.memory_space<vmem>>, %arg5: memref<1x16x8xf32, #tpu.memory_space<vmem>>) attributes {dimension_semantics = [#tpu.dimension_semantics<parallel>, #tpu.dimension_semantics<parallel>], iteration_bounds = array<i64: 8, 1>, scalar_prefetch = 0 : i64, scratch_operands = 0 : i64, tpu.core_type = #tpu.core_type<tc>, window_params = [{transform_indices = @transform_0, window_bounds = array<i64: 1, 16, 8>}, {transform_indices = @transform_1, window_bounds = array<i64: 1, 12, 8>}, {transform_indices = @transform_2, window_bounds = array<i64: 1, 12, 8>}, {transform_indices = @transform_3, window_bounds = array<i64: 1, 16, 8>}]} {
    %c0 = arith.constant 0 : index
    %c0_0 = arith.constant 0 : index
    %c0_1 = arith.constant 0 : index
    %0 = vector.load %arg2[%c0, %c0_0, %c0_1] : memref<1x16x8xf32, #tpu.memory_space<vmem>>, vector<1x16x8xf32>
    %1 = vector.shape_cast %0 : vector<1x16x8xf32> to vector<16x8xf32>
    %c0_2 = arith.constant 0 : index
    %c0_3 = arith.constant 0 : index
    %c0_4 = arith.constant 0 : index
    %2 = vector.load %arg3[%c0_2, %c0_3, %c0_4] : memref<1x12x8xf32, #tpu.memory_space<vmem>>, vector<1x12x8xf32>
    %3 = vector.shape_cast %2 : vector<1x12x8xf32> to vector<12x8xf32>
    "tpu.trace_start"() <{level = 10 : i32, message = "td,sd->ts"}> : () -> ()
    %cst = arith.constant dense<0.000000e+00> : vector<16x12xf32>
    %4 = tpu.matmul %1, %3, %cst {dimension_numbers = #tpu.dot_dimension_numbers<[1], [1], [0], [0], [0, 0, 1, 0], [], []>} : vector<16x8xf32>, vector<12x8xf32>, vector<16x12xf32> -> vector<16x12xf32>
    "tpu.trace_stop"() : () -> ()
    %cst_5 = arith.constant 0.353553385 : f32
    %5 = vector.broadcast %cst_5 : f32 to vector<16x12xf32>
    %6 = arith.mulf %4, %5 : vector<16x12xf32>
    %cst_6 = arith.constant dense<0xFF800000> : vector<16xf32>
    %7 = vector.multi_reduction <maximumf>, %6, %cst_6 [1] : vector<16x12xf32> to vector<16xf32>
    %8 = vector.shape_cast %7 : vector<16xf32> to vector<16x1xf32>
    %9 = vector.broadcast %8 : vector<16x1xf32> to vector<16x12xf32>
    %10 = arith.subf %6, %9 : vector<16x12xf32>
    %11 = math.exp %10 : vector<16x12xf32>
    %cst_7 = arith.constant dense<0.000000e+00> : vector<16xf32>
    %12 = vector.multi_reduction <add>, %11, %cst_7 [1] : vector<16x12xf32> to vector<16xf32>
    %13 = vector.shape_cast %12 : vector<16xf32> to vector<16x1xf32>
    %c0_8 = arith.constant 0 : index
    %c0_9 = arith.constant 0 : index
    %c0_10 = arith.constant 0 : index
    %14 = vector.load %arg4[%c0_8, %c0_9, %c0_10] : memref<1x12x8xf32, #tpu.memory_space<vmem>>, vector<1x12x8xf32>
    %15 = vector.shape_cast %14 : vector<1x12x8xf32> to vector<12x8xf32>
    %cst_11 = arith.constant dense<0.000000e+00> : vector<16x8xf32>
    %16 = tpu.matmul %11, %15, %cst_11 {dimension_numbers = #tpu.dot_dimension_numbers<[1], [0], [0], [1], [0, 0, 1, 1], [], []>} : vector<16x12xf32>, vector<12x8xf32>, vector<16x8xf32> -> vector<16x8xf32>
    %17 = vector.broadcast %13 : vector<16x1xf32> to vector<16x8xf32>
    %18 = arith.divf %16, %17 : vector<16x8xf32>
    %c0_12 = arith.constant 0 : index
    %c0_13 = arith.constant 0 : index
    %c0_14 = arith.constant 0 : index
    %19 = vector.load %arg5[%c0_12, %c0_13, %c0_14] : memref<1x16x8xf32, #tpu.memory_space<vmem>>, vector<1x16x8xf32>
    %20 = vector.shape_cast %19 : vector<1x16x8xf32> to vector<16x8xf32>
    %21 = vector.shape_cast %18 : vector<16x8xf32> to vector<1x16x8xf32>
    tpu.vector_store %arg5[%c0_12, %c0_13, %c0_14], %21 {strides = array<i32>} : memref<1x16x8xf32, #tpu.memory_space<vmem>>, vector<1x16x8xf32>,
    return
  }
  func.func @transform_0(%arg0: i32, %arg1: i32) -> (i32, i32, i32) {
    %c0_i32 = arith.constant 0 : i32
    %c0_i32_0 = arith.constant 0 : i32
    return %arg0, %arg1, %c0_i32 : i32, i32, i32
  }
  func.func @transform_1(%arg0: i32, %arg1: i32) -> (i32, i32, i32) {
    %c0_i32 = arith.constant 0 : i32
    %c0_i32_0 = arith.constant 0 : i32
    %c0_i32_1 = arith.constant 0 : i32
    return %arg0, %c0_i32, %c0_i32_0 : i32, i32, i32
  }
  func.func @transform_2(%arg0: i32, %arg1: i32) -> (i32, i32, i32) {
    %c0_i32 = arith.constant 0 : i32
    %c0_i32_0 = arith.constant 0 : i32
    %c0_i32_1 = arith.constant 0 : i32
    return %arg0, %c0_i32, %c0_i32_0 : i32, i32, i32
  }
  func.func @transform_3(%arg0: i32, %arg1: i32) -> (i32, i32, i32) {
    %c0_i32 = arith.constant 0 : i32
    %c0_i32_0 = arith.constant 0 : i32
    return %arg0, %arg1, %c0_i32 : i32, i32, i32
  }
}

</mosaic_0001>

<bundles_post_ra>
// kernel: multi_head_attention.5
= control target key start
LH: loop header
LB: loop body
LE: loop exit
PB: predicated region body
PF: predicated region fallthrough
CT: control target
= control target key end

     0   :  { %v166_v0 = vmov 0.0|0.0   ;;  %vm167_vm0 = vmmov 0   ;;  %v168_v6 = vmov 0.0   ;;  %vm28_vm1 = vcmask 261120   ;;  %s231_s1 = inlined_call_operand.vmem [shape: f32[32,32], index: 1, kind: input, shape index: {}]   ;;  %s232_s0 = inlined_call_operand.vmem [shape: f32[24,32], index: 0, kind: input, shape index: {}]   ;;  %s233_s2 = inlined_call_operand.vmem [shape: f32[1,32], index: 2, kind: input, shape index: {}]   ;;  %s234_s3 = inlined_call_operand.vmem [shape: f32[24,32], index: 3, kind: output, shape index: {}]  }
   0x1   :  { %159 = vmatprep.subr.bf16.mxu1 %v166_v0  ;;  %v17_v1 = vld [vmem:[%s231_s1] sm:$0xff]  ;;  %v18_v2 = vld [vmem:[%s231_s1 + $0x8] sm:$0xff]  ;;  %153 = vmatprep.subr.bf16.mxu0 %v166_v0  ;;  %v19_v3 = vld [vmem:[%s231_s1 + $0x10] sm:$0xff] }
   0x2   :  { %v154_v4 = vpack.c.bf16 %v18_v2, %v17_v1  ;;  %v20_v5 = vld [vmem:[%s231_s1 + $0x18] sm:$0xff]  ;;  %147 = vmatprep.mubr.msk.f32.mxu1 %vm167_vm0, %v168_v6  ;;  %144 = vmatprep.mubr.msk.f32.mxu0 %vm167_vm0, %v168_v6  ;;  %v15_v8 = vld [vmem:[%s232_s0 + $0x8] sm:$0xff]  ;;  %v14_v9 = vld [vmem:[%s232_s0] sm:$0xff] }
   0x3   :  { %v157_v7 = vpack.c.bf16 %v20_v5, %v19_v3  ;;  %v16_v10 = vld [vmem:[%s232_s0 + $0x10] sm:$0xff]  ;;  %v125_v11 = vld [vmem:[%s233_s2] ss:$0 sm:$0xff] }
   0x4   :  { %161 = vmatpush3.bf16.msra.mxu1 %v154_v4  ;;  %155 = vmatpush3.bf16.msra.mxu0 %v154_v4 }
   0x5   :  { %160 = vmatprep.subr.bf16.mxu1 %v166_v0  ;;  %156 = vmatprep.subr.bf16.mxu0 %v166_v0 }
   0x8   :  { %162 = vmatpush3.bf16.msra.mxu1 %v157_v7  ;;  %158 = vmatpush3.bf16.msra.mxu0 %v157_v7 }
   0xb   :  { %148 = vmatmul.mubr.msk.f32.vlgmr.msra.gmra.mrb[0].mxu1 %vm28_vm1, %v15_v8  ;;  %145 = vmatmul.mubr.msk.f32.vlgmr.msra.gmra.mrb[0].mxu0 %vm28_vm1, %v14_v9 }
   0xc   :  { %150 = vmatprep.mubr.msk.f32.mxu1 %vm167_vm0, %v168_v6 }
   0xf   :  { %151 = vmatmul.mubr.msk.f32.gmra.mrb[2].mxu1 %vm28_vm1, %v16_v10 }
  0xde   :  { %v109_v12 = vpop.f32.mrb[0].mxu1  ;;  %v104_v13 = vpop.f32.mrb[0].mxu0 }
  0xdf   :  { %v110_v14 = vadd.f32 %v125_v11, %v109_v12  ;;  %v149_v15 = vpop.f32.mrb[1].mxu1  ;;  %v105_v16 = vadd.f32 %v125_v11, %v104_v13  ;;  %v146_v17 = vpop.f32.mrb[1].mxu0 }
  0xe1   :  { %119 = vst.msk [vmem:[%s234_s3 + $0x8] sm:$0xff] %vm28_vm1, %v110_v14  ;;  %118 = vst.msk [vmem:[%s234_s3] sm:$0xff] %vm28_vm1, %v105_v16 }
  0xe2   :  { %v114_v18 = vpop.f32.mrb[2].mxu1 }
  0xe3   :  { %v115_v19 = vadd.f32 %v125_v11, %v114_v18  ;;  %v152_v20 = vpop.f32.mrb[3].mxu1 }
  0xe5   :  { %120 = vst.msk [vmem:[%s234_s3 + $0x10] sm:$0xff] %vm28_vm1, %v115_v19 }

// kernel: multi_head_attention.8
= control target key start
LH: loop header
LB: loop body
LE: loop exit
PB: predicated region body
PF: predicated region fallthrough
CT: control target
= control target key end

     0   :  { %s705_s12 = smov 0   ;;  %s707_s13 = smov 0   ;;  %s762_s0 = inlined_call_operand.vmem [shape: f32[8,16,8], index: 0, kind: input, shape index: {}]   ;;  %s763_s1 = inlined_call_operand.vmem [shape: f32[8,12,8], index: 1, kind: input, shape index: {}]   ;;  %s764_s2 = inlined_call_operand.vmem [shape: f32[8,12,8], index: 2, kind: input, shape index: {}]   ;;  %s765_s3 = inlined_call_operand.vmem [shape: f32[8,16,8], index: 3, kind: output, shape index: {}]  }
   0x1   :  { %s709_s14 = smov 0  }
   0x2 LB: > { %s25_s15 = sadd.s32 1, %s678_s13  ;;  %p571_p0 = scmp.ge.s32.totalorder %s682_s14, 1  ;;  %s682_s14 = sphi %s709_s14, %s13_s14   ;;  %s678_s13 = sphi %s707_s13, %s767_s13   ;;  %s674_s12 = sphi %s705_s12, %s766_s12  }
   0x3   : > { %p27_p1 = scmp.ge.s32.totalorder %s25_s15, 8  ;;  %p178_p2 = scmp.lt.s32.totalorder %s682_s14, 9 }
   0x5   : > { %s769_s15 = smov (%p27_p1, %s25_s15), 0  ;;  %p179_p3 = pnand %p571_p0, %p178_p2 }
   0x6   : > { %p221_p4 = scmp.lt.s32.totalorder (!%p179_p3), %s674_s12, 7  ;;  %vm254_vm0 = vcmask (!%p179_p3), 64512   ;;  %vm344_vm2 = vcmask (!%p179_p3), 97280   ;;  %vm371_vm3 = vcmask (!%p179_p3), 1043456   ;;  %vm684_vm4 = vmmov (!%p179_p3), 1  }
   0x7   : > { %182 = sbr.rel (%p179_p3) target bundleno = 621 (0x26d), region = 32  ;;  %vm616_vm1 = vmpackc.low (!%p179_p3), %vm254_vm0, %vm254_vm0 }
   0x8   : > { %vm622_vm5 = vmpackc.low (!%p179_p3), %vm371_vm3, %vm684_vm4 }
   0xe   : > { %s771_s12 = smov (!%p221_p4, %s674_s12), 7 }
   0xf   : > { %s723_s16 = sshll.u32 %s771_s12, 4 }
  0x10   : > { %s234_s19 = scalar_lea.vmem %s763_s1, %s723_s16  ;;  %s228_s22 = scalar_lea.vmem %s762_s0, %s723_s16 }
  0x11   : > { %v252_v0 = vld [vmem:[%s234_s19] sm:$0xff]  ;;  %v253_v1 = vld [vmem:[%s234_s19 + $0x8] sm:$0xf]  ;;  %s239_s25 = scalar_lea.vmem %s764_s2, %s723_s16  ;;  %s248_s28 = scalar_lea.vmem %s765_s3, %s723_s16 }
  0x12   : > { %v250_v2 = vld [vmem:[%s228_s22] sm:$0xff]  ;;  %v615_v3 = vpack.c.bf16 %v253_v1, %v252_v0  ;;  %v251_v4 = vld [vmem:[%s228_s22 + $0x8] sm:$0xff] }
  0x13   : > { %605 = vmatprep.mubr.msk.f32.mxu0 %vm254_vm0, %v250_v2  ;;  %v363_v11 = vld [vmem:[%s239_s25] sm:$0xff]  ;;  %v364_v12 = vld [vmem:[%s239_s25 + $0x8] sm:$0xf] }
  0x14   : > { %617 = vmatprep.subr.msk.bf16.mxu0 %vm616_vm1, %v615_v3  ;;  %v621_v13 = vpack.c.bf16 %v364_v12, %v363_v11 }
  0x15   : > { %620 = vmatpush3.bf16.xpose.msk.msra.mxu0 %vm616_vm1, %v615_v3 }
  0x16   : > { %623 = vmatprep.subr.msk.bf16.mxu1 %vm622_vm5, %v621_v13 }
  0x17   : > { %626 = vmatpush3.bf16.msk.msra.mxu1 %vm622_vm5, %v621_v13 }
  0x1c   : > { %606 = vmatmul.mubr.msk.f32.vlgmr.msra.gmra.mrb[0].mxu0 %vm254_vm0, %v251_v4 }
  0xef   : > { %v607_v5 = vpop.f32.mrb[0].mxu0 }
  0xf0   : > { %v333_v6 = vpop.f32.mrb[1].mxu0  ;;  %v343_v8 = vmul.f32 0.35355338, %v607_v5 }
  0xf1   : > { %v342_v7 = vmul.f32 0.35355338, %v333_v6 }
  0xf2   : > { %v348_v10 = vsel %vm344_vm2, %v343_v8, -inf }
  0xf3   : > { %v345_v9 = vsel %vm344_vm2, %v342_v7, -inf }
  0xf4   : > { %346 = vmax.xlane.f32.xlu0 %v345_v9 }
  0xf8   : > { %349 = vmax.xlane.f32.xlu0 %v348_v10 }
 0x181   : > { %v347_v14 = vpop.xlane.xlu0 %346 }
 0x182   : > { %v351_v15 = vsub.f32 %v342_v7, %v347_v14 }
 0x184   : > { %v353_v16 = vmul.f32 1.442695, %v351_v15 }
 0x185   : > { %v350_v17 = vpop.xlane.xlu0 %349 }
 0x186   : > { %652 = vpow2.f32 %v353_v16  ;;  %v352_v18 = vsub.f32 %v343_v8, %v350_v17 }
 0x188   : > { %v355_v19 = vmul.f32 1.442695, %v352_v18 }
 0x18a   : > { %654 = vpow2.f32 %v355_v19 }
 0x190   : > { %v653_v20 = vpop.eup %652 }
 0x191   : > { %612 = vmatprep.mubr.msk.f32.mxu1 %vm344_vm2, %v653_v20  ;;  %v357_v21 = vsel %vm344_vm2, %v653_v20, 0.0 }
 0x192   : > { %358 = vadd.xlane.f32.xlu1 %v357_v21 }
 0x194   : > { %v655_v22 = vpop.eup %654 }
 0x195   : > { %613 = vmatmul.mubr.msk.f32.vlgmr.msra.gmra.mrb[0].mxu1 %vm344_vm2, %v655_v22  ;;  %v360_v23 = vsel %vm344_vm2, %v655_v22, 0.0 }
 0x196   : > { %361 = vadd.xlane.f32.xlu1 %v360_v23 }
 0x21f   : > { %v359_v24 = vpop.xlane.xlu1 %358 }
 0x223   : > { %v362_v25 = vpop.xlane.xlu1 %361 }
 0x224   : > { %656 = vrcp.f32 %v362_v25 }
 0x225   : > { %658 = vrcp.f32 %v359_v24 }
 0x22e   : > { %v657_v26 = vpop.eup %656 }
 0x22f   : > { %v659_v28 = vpop.eup %658 }
 0x268   : > { %v614_v27 = vpop.f32.mrb[0].mxu1 }
 0x269   : > { %v453_v29 = vmul.f32 %v657_v26, %v614_v27  ;;  %v441_v30 = vpop.f32.mrb[1].mxu1 }
 0x26a   : > { %v451_v31 = vmul.f32 %v659_v28, %v441_v30 }
 0x26b   : > { %455 = vst.msk [vmem:[%s248_s28 + $0x8] sm:$0xff] %vm254_vm0, %v453_v29 }
 0x26c   : > { %454 = vst.msk [vmem:[%s248_s28] sm:$0xff] %vm254_vm0, %v451_v31 }
 0x26d PF: > { %s13_s14 = sadd.s32 1, %s682_s14   ;;  %s766_s12 = smov %s678_s13 }
 0x26e   : > { %p10_p5 = scmp.ge.s32.totalorder %s13_s14, 10   ;;  %s767_s13 = smov %s769_s15 }
 0x270   :  { %12 = sbr.rel (!%p10_p5) target bundleno = 2 (0x2), region = 68 }

</bundles_post_ra>
